<compile_context>
chip_gen: v7x
topology: tpu7x:2x2x1
jax: 0.10.0
libtpu: 0.0.40
codegen_flags: <defaults>
</compile_context>

<pallas_src>
import functools

import jax
import jax.numpy as jnp
from jax.experimental import pallas as pl
from jax.experimental.pallas import tpu as pltpu

_NEG_INF = -1e30


def _round_up(x, m):
    return ((x + m - 1) // m) * m


def _cope_kernel(q_ref, logits_ref, mask_ref, pe_ref, rev_ref, out_ref, *, npos_max):
    # q_ref:      (1, TQ, D)   native dtype
    # logits_ref: (1, TQ, Kp)  native dtype
    # mask_ref:   (TQ, Kp)     f32, shared across batch*head (VMEM-resident)
    # pe_ref:     (D, P)       native dtype (resident)
    # rev_ref:    (Kp, Kp)     f32 lower-triangular ones (resident)
    # out_ref:    (1, TQ, Kp)
    attn = logits_ref[0].astype(jnp.float32) + mask_ref[...]            # (TQ, Kp)
    gates = jax.nn.sigmoid(attn)

    # Reverse cumulative sum along K (flip -> cumsum -> flip in the reference)
    # as one MXU matmul against a resident triangular matrix:
    #   pos[:, i] = sum_{j >= i} gates[:, j]
    pos = jnp.dot(gates, rev_ref[...], preferred_element_type=jnp.float32)
    pos = jnp.minimum(pos, jnp.float32(npos_max - 1))                   # clamp

    pos_floor = jnp.floor(pos)
    w = pos - pos_floor

    # Interpolation table: (TQ, D) @ (D, P) -> (TQ, P)
    logits_int = jnp.dot(q_ref[0], pe_ref[...], preferred_element_type=jnp.float32)

    # gather(dim=-1) as a static unrolled select over npos_max.  One predicate
    # per p: the "ceil" value is gathered at min(p+1, P-1), which is exact
    # because whenever ceil(pos) != floor(pos)+1 we have w == 0.
    g_floor = jnp.zeros_like(attn)
    g_ceil = jnp.zeros_like(attn)
    for p in range(npos_max):
        pc = min(p + 1, npos_max - 1)
        m = pos_floor == jnp.float32(p)
        g_floor = jnp.where(m, logits_int[:, p:p + 1], g_floor)
        g_ceil = jnp.where(m, logits_int[:, pc:pc + 1], g_ceil)

    # Fused epilogue: attn + floor*(1-w) + ceil*w == attn + floor + w*(ceil-floor)
    out_ref[0] = (attn + g_floor + w * (g_ceil - g_floor)).astype(out_ref.dtype)


def cope_forward(query, attn_logits, pos_emb, mask=None, *, q_tile=256):
    """Pallas implementation of ContextualPositionEmbedding.forward."""
    B, H, Q, D = query.shape
    K = attn_logits.shape[-1]
    P = pos_emb.shape[-1]
    BH = B * H
    out_dtype = attn_logits.dtype

    # ---- mask handling: keep it (Q, K)-shaped so it stays VMEM-resident ----
    al = attn_logits.reshape(BH, Q, K)
    if mask is None:
        mk = jnp.zeros((Q, K), dtype=jnp.float32)
    else:
        m = jnp.asarray(mask)
        if m.ndim <= 2 or all(int(s) == 1 for s in m.shape[:-2]):
            mk = jnp.broadcast_to(m.reshape(m.shape[-2:]), (Q, K)).astype(jnp.float32)
        else:
            # Per-(batch, head) mask: fold into the logits outside the kernel.
            al = (attn_logits + m).reshape(BH, Q, K)
            mk = jnp.zeros((Q, K), dtype=jnp.float32)

    # ---- pad so the lane dim is a multiple of 128 and the Q tile divides Q.
    #      Padded key columns get a -inf mask -> sigmoid gate exactly 0, so the
    #      reverse cumsum over real columns is unchanged. ----
    TQ = min(q_tile, _round_up(Q, 8))
    Q_pad = _round_up(Q, TQ)
    K_pad = _round_up(K, 128)
    dq, dk = Q_pad - Q, K_pad - K

    q = query.reshape(BH, Q, D)
    if dq:
        q = jnp.pad(q, ((0, 0), (0, dq), (0, 0)))
    if dq or dk:
        al = jnp.pad(al, ((0, 0), (0, dq), (0, dk)))
        mk = jnp.pad(mk, ((0, dq), (0, dk)),
                     constant_values=((0.0, 0.0), (0.0, _NEG_INF)))

    pe = pos_emb.reshape(D, P)
    # Reverse-cumsum matrix M[j, i] = 1 iff j >= i; built once, DMA'd once
    # (constant index_map), never rebuilt on the VPU inside the kernel.
    rev = jnp.tril(jnp.ones((K_pad, K_pad), dtype=jnp.float32))

    n_qt = Q_pad // TQ
    kernel = functools.partial(_cope_kernel, npos_max=P)

    out = pl.pallas_call(
        kernel,
        out_shape=jax.ShapeDtypeStruct((BH, Q_pad, K_pad), out_dtype),
        grid_spec=pltpu.PrefetchScalarGridSpec(
            num_scalar_prefetch=0,
            # B*H iterates fastest -> mask / pos_emb / rev matrix stay resident.
            grid=(n_qt, BH),
            in_specs=[
                pl.BlockSpec((1, TQ, D), lambda qi, bh: (bh, qi, 0)),
                pl.BlockSpec((1, TQ, K_pad), lambda qi, bh: (bh, qi, 0)),
                pl.BlockSpec((TQ, K_pad), lambda qi, bh: (qi, 0)),
                pl.BlockSpec((D, P), lambda qi, bh: (0, 0)),
                pl.BlockSpec((K_pad, K_pad), lambda qi, bh: (0, 0)),
            ],
            out_specs=pl.BlockSpec((1, TQ, K_pad), lambda qi, bh: (bh, qi, 0)),
        ),
        compiler_params=pltpu.CompilerParams(
            dimension_semantics=("parallel", "parallel"),
            vmem_limit_bytes=48 * 1024 * 1024,
        ),
    )(q, al, mk, pe, rev)

    return out[:, :Q, :K].reshape(B, H, Q, K)


def cope_reference(query, attn_logits, pos_emb, mask=None):
    """Pure-JAX reference mirroring the PyTorch forward exactly."""
    if mask is not None:
        attn_logits = attn_logits + mask
    gates = jax.nn.sigmoid(attn_logits)
    pos = jnp.flip(jnp.cumsum(jnp.flip(gates, -1), axis=-1), -1)
    npos_max = pos_emb.shape[-1]
    pos = jnp.minimum(pos, npos_max - 1)
    pos_ceil = jnp.ceil(pos).astype(jnp.int32)
    pos_floor_i = jnp.floor(pos).astype(jnp.int32)
    pe = pos_emb.reshape(pos_emb.shape[-2], pos_emb.shape[-1])
    logits_int = jnp.einsum('bhqd,dp->bhqp', query, pe)
    logits_ceil = jnp.take_along_axis(logits_int, pos_ceil, axis=-1)
    logits_floor = jnp.take_along_axis(logits_int, pos_floor_i, axis=-1)
    w = pos - jnp.floor(pos)
    return attn_logits + logits_ceil * w + logits_floor * (1.0 - w)


if __name__ == "__main__":
    B, H, SEQ, HEAD_DIM, NPOS_MAX = 2, 2, 8, 32, 8

    key = jax.random.PRNGKey(0)
    k1, k2, k3, k4 = jax.random.split(key, 4)

    query = jax.random.normal(k1, (B, H, SEQ, HEAD_DIM), dtype=jnp.float32)
    attn_logits = jax.random.normal(k2, (B, H, SEQ, SEQ), dtype=jnp.float32)
    # Module's __init__ uses zeros; use small deterministic random values so the
    # interpolation path is actually exercised (synthetic weights, no checkpoint).
    pos_emb = 0.02 * jax.random.normal(k3, (1, 1, HEAD_DIM, NPOS_MAX), dtype=jnp.float32)
    # Causal additive mask (0 on/below diagonal, large negative above), shared
    # across batch and heads.
    causal = jnp.tril(jnp.ones((SEQ, SEQ), dtype=jnp.float32))
    mask = jnp.where(causal == 1.0, 0.0, -1e4)[None, None, :, :]

    out = cope_forward(query, attn_logits, pos_emb, mask)
    out = jax.block_until_ready(out)

    ref = cope_reference(query, attn_logits, pos_emb, mask)
    assert out.shape == (B, H, SEQ, SEQ)
    assert out.dtype == attn_logits.dtype
    assert jnp.allclose(out, ref, atol=1e-3, rtol=1e-3), "mismatch vs reference"

    print("KERNEL_OK")
</pallas_src>

<mosaic_0001>
module attributes {stable_mosaic.version = 11 : i64} {
  func.func @_cope_kernel(%arg0: i32, %arg1: i32, %arg2: memref<1x8x32xf32, #tpu.memory_space<vmem>>, %arg3: memref<1x8x128xf32, #tpu.memory_space<vmem>>, %arg4: memref<8x128xf32, #tpu.memory_space<vmem>>, %arg5: memref<32x8xf32, #tpu.memory_space<vmem>>, %arg6: memref<128x128xf32, #tpu.memory_space<vmem>>, %arg7: memref<1x8x128xf32, #tpu.memory_space<vmem>>) attributes {dimension_semantics = [#tpu.dimension_semantics<parallel>, #tpu.dimension_semantics<parallel>], iteration_bounds = array<i64: 1, 4>, scalar_prefetch = 0 : i64, scratch_operands = 0 : i64, tpu.core_type = #tpu.core_type<tc>, window_params = [{transform_indices = @transform_0, window_bounds = array<i64: 1, 8, 32>}, {transform_indices = @transform_1, window_bounds = array<i64: 1, 8, 128>}, {transform_indices = @transform_2, window_bounds = array<i64: 8, 128>}, {pipeline_mode = #tpu.pipeline_mode<synchronous>, transform_indices = @transform_3, window_bounds = array<i64: 32, 8>}, {pipeline_mode = #tpu.pipeline_mode<synchronous>, transform_indices = @transform_4, window_bounds = array<i64: 128, 128>}, {transform_indices = @transform_5, window_bounds = array<i64: 1, 8, 128>}]} {
    %c0 = arith.constant 0 : index
    %c0_0 = arith.constant 0 : index
    %c0_1 = arith.constant 0 : index
    %0 = vector.load %arg3[%c0, %c0_0, %c0_1] : memref<1x8x128xf32, #tpu.memory_space<vmem>>, vector<1x8x128xf32>
    %1 = vector.shape_cast %0 : vector<1x8x128xf32> to vector<8x128xf32>
    %c0_2 = arith.constant 0 : index
    %c0_3 = arith.constant 0 : index
    %2 = vector.load %arg4[%c0_2, %c0_3] : memref<8x128xf32, #tpu.memory_space<vmem>>, vector<8x128xf32>
    %3 = arith.addf %1, %2 : vector<8x128xf32>
    %4 = arith.negf %3 : vector<8x128xf32>
    %5 = math.exp %4 : vector<8x128xf32>
    %cst = arith.constant 1.000000e+00 : f32
    %6 = vector.broadcast %cst : f32 to vector<8x128xf32>
    %7 = arith.addf %6, %5 : vector<8x128xf32>
    %8 = arith.divf %6, %7 : vector<8x128xf32>
    %c0_4 = arith.constant 0 : index
    %c0_5 = arith.constant 0 : index
    %9 = vector.load %arg6[%c0_4, %c0_5] : memref<128x128xf32, #tpu.memory_space<vmem>>, vector<128x128xf32>
    %cst_6 = arith.constant dense<0.000000e+00> : vector<8x128xf32>
    %10 = tpu.matmul %8, %9, %cst_6 {dimension_numbers = #tpu.dot_dimension_numbers<[1], [0], [0], [1], [0, 0, 1, 1], [], []>} : vector<8x128xf32>, vector<128x128xf32>, vector<8x128xf32> -> vector<8x128xf32>
    %cst_7 = arith.constant 7.000000e+00 : f32
    %11 = vector.broadcast %cst_7 : f32 to vector<8x128xf32>
    %12 = arith.minimumf %10, %11 : vector<8x128xf32>
    %13 = math.floor %12 : vector<8x128xf32>
    %14 = arith.subf %12, %13 : vector<8x128xf32>
    %c0_8 = arith.constant 0 : index
    %c0_9 = arith.constant 0 : index
    %c0_10 = arith.constant 0 : index
    %15 = vector.load %arg2[%c0_8, %c0_9, %c0_10] : memref<1x8x32xf32, #tpu.memory_space<vmem>>, vector<1x8x32xf32>
    %16 = vector.shape_cast %15 : vector<1x8x32xf32> to vector<8x32xf32>
    %c0_11 = arith.constant 0 : index
    %c0_12 = arith.constant 0 : index
    %17 = vector.load %arg5[%c0_11, %c0_12] : memref<32x8xf32, #tpu.memory_space<vmem>>, vector<32x8xf32>
    %cst_13 = arith.constant dense<0.000000e+00> : vector<8x8xf32>
    %18 = tpu.matmul %16, %17, %cst_13 {dimension_numbers = #tpu.dot_dimension_numbers<[1], [0], [0], [1], [0, 0, 1, 1], [], []>} : vector<8x32xf32>, vector<32x8xf32>, vector<8x8xf32> -> vector<8x8xf32>
    %cst_14 = arith.constant 0.000000e+00 : f32
    %19 = vector.broadcast %cst_14 : f32 to vector<8x128xf32>
    %cst_15 = arith.constant 0.000000e+00 : f32
    %20 = vector.broadcast %cst_15 : f32 to vector<8x128xf32>
    %cst_16 = arith.constant 0.000000e+00 : f32
    %21 = vector.broadcast %cst_16 : f32 to vector<8x128xf32>
    %22 = arith.cmpf oeq, %13, %21 : vector<8x128xf32>
    %23 = vector.extract_strided_slice %18 {offsets = [0, 0], sizes = [8, 1], strides = [1, 1]} : vector<8x8xf32> to vector<8x1xf32>
    %24 = vector.shape_cast %23 : vector<8x1xf32> to vector<8x1xf32>
    %25 = vector.broadcast %24 : vector<8x1xf32> to vector<8x128xf32>
    %26 = arith.select %22, %25, %19 : vector<8x128xi1>, vector<8x128xf32>
    %27 = vector.extract_strided_slice %18 {offsets = [0, 1], sizes = [8, 1], strides = [1, 1]} : vector<8x8xf32> to vector<8x1xf32>
    %28 = vector.shape_cast %27 : vector<8x1xf32> to vector<8x1xf32>
    %29 = vector.broadcast %28 : vector<8x1xf32> to vector<8x128xf32>
    %30 = arith.select %22, %29, %20 : vector<8x128xi1>, vector<8x128xf32>
    %cst_17 = arith.constant 1.000000e+00 : f32
    %31 = vector.broadcast %cst_17 : f32 to vector<8x128xf32>
    %32 = arith.cmpf oeq, %13, %31 : vector<8x128xf32>
    %33 = vector.extract_strided_slice %18 {offsets = [0, 1], sizes = [8, 1], strides = [1, 1]} : vector<8x8xf32> to vector<8x1xf32>
    %34 = vector.shape_cast %33 : vector<8x1xf32> to vector<8x1xf32>
    %35 = vector.broadcast %34 : vector<8x1xf32> to vector<8x128xf32>
    %36 = arith.select %32, %35, %26 : vector<8x128xi1>, vector<8x128xf32>
    %37 = vector.extract_strided_slice %18 {offsets = [0, 2], sizes = [8, 1], strides = [1, 1]} : vector<8x8xf32> to vector<8x1xf32>
    %38 = vector.shape_cast %37 : vector<8x1xf32> to vector<8x1xf32>
    %39 = vector.broadcast %38 : vector<8x1xf32> to vector<8x128xf32>
    %40 = arith.select %32, %39, %30 : vector<8x128xi1>, vector<8x128xf32>
    %cst_18 = arith.constant 2.000000e+00 : f32
    %41 = vector.broadcast %cst_18 : f32 to vector<8x128xf32>
    %42 = arith.cmpf oeq, %13, %41 : vector<8x128xf32>
    %43 = vector.extract_strided_slice %18 {offsets = [0, 2], sizes = [8, 1], strides = [1, 1]} : vector<8x8xf32> to vector<8x1xf32>
    %44 = vector.shape_cast %43 : vector<8x1xf32> to vector<8x1xf32>
    %45 = vector.broadcast %44 : vector<8x1xf32> to vector<8x128xf32>
    %46 = arith.select %42, %45, %36 : vector<8x128xi1>, vector<8x128xf32>
    %47 = vector.extract_strided_slice %18 {offsets = [0, 3], sizes = [8, 1], strides = [1, 1]} : vector<8x8xf32> to vector<8x1xf32>
    %48 = vector.shape_cast %47 : vector<8x1xf32> to vector<8x1xf32>
    %49 = vector.broadcast %48 : vector<8x1xf32> to vector<8x128xf32>
    %50 = arith.select %42, %49, %40 : vector<8x128xi1>, vector<8x128xf32>
    %cst_19 = arith.constant 3.000000e+00 : f32
    %51 = vector.broadcast %cst_19 : f32 to vector<8x128xf32>
    %52 = arith.cmpf oeq, %13, %51 : vector<8x128xf32>
    %53 = vector.extract_strided_slice %18 {offsets = [0, 3], sizes = [8, 1], strides = [1, 1]} : vector<8x8xf32> to vector<8x1xf32>
    %54 = vector.shape_cast %53 : vector<8x1xf32> to vector<8x1xf32>
    %55 = vector.broadcast %54 : vector<8x1xf32> to vector<8x128xf32>
    %56 = arith.select %52, %55, %46 : vector<8x128xi1>, vector<8x128xf32>
    %57 = vector.extract_strided_slice %18 {offsets = [0, 4], sizes = [8, 1], strides = [1, 1]} : vector<8x8xf32> to vector<8x1xf32>
    %58 = vector.shape_cast %57 : vector<8x1xf32> to vector<8x1xf32>
    %59 = vector.broadcast %58 : vector<8x1xf32> to vector<8x128xf32>
    %60 = arith.select %52, %59, %50 : vector<8x128xi1>, vector<8x128xf32>
    %cst_20 = arith.constant 4.000000e+00 : f32
    %61 = vector.broadcast %cst_20 : f32 to vector<8x128xf32>
    %62 = arith.cmpf oeq, %13, %61 : vector<8x128xf32>
    %63 = vector.extract_strided_slice %18 {offsets = [0, 4], sizes = [8, 1], strides = [1, 1]} : vector<8x8xf32> to vector<8x1xf32>
    %64 = vector.shape_cast %63 : vector<8x1xf32> to vector<8x1xf32>
    %65 = vector.broadcast %64 : vector<8x1xf32> to vector<8x128xf32>
    %66 = arith.select %62, %65, %56 : vector<8x128xi1>, vector<8x128xf32>
    %67 = vector.extract_strided_slice %18 {offsets = [0, 5], sizes = [8, 1], strides = [1, 1]} : vector<8x8xf32> to vector<8x1xf32>
    %68 = vector.shape_cast %67 : vector<8x1xf32> to vector<8x1xf32>
    %69 = vector.broadcast %68 : vector<8x1xf32> to vector<8x128xf32>
    %70 = arith.select %62, %69, %60 : vector<8x128xi1>, vector<8x128xf32>
    %cst_21 = arith.constant 5.000000e+00 : f32
    %71 = vector.broadcast %cst_21 : f32 to vector<8x128xf32>
    %72 = arith.cmpf oeq, %13, %71 : vector<8x128xf32>
    %73 = vector.extract_strided_slice %18 {offsets = [0, 5], sizes = [8, 1], strides = [1, 1]} : vector<8x8xf32> to vector<8x1xf32>
    %74 = vector.shape_cast %73 : vector<8x1xf32> to vector<8x1xf32>
    %75 = vector.broadcast %74 : vector<8x1xf32> to vector<8x128xf32>
    %76 = arith.select %72, %75, %66 : vector<8x128xi1>, vector<8x128xf32>
    %77 = vector.extract_strided_slice %18 {offsets = [0, 6], sizes = [8, 1], strides = [1, 1]} : vector<8x8xf32> to vector<8x1xf32>
    %78 = vector.shape_cast %77 : vector<8x1xf32> to vector<8x1xf32>
    %79 = vector.broadcast %78 : vector<8x1xf32> to vector<8x128xf32>
    %80 = arith.select %72, %79, %70 : vector<8x128xi1>, vector<8x128xf32>
    %cst_22 = arith.constant 6.000000e+00 : f32
    %81 = vector.broadcast %cst_22 : f32 to vector<8x128xf32>
    %82 = arith.cmpf oeq, %13, %81 : vector<8x128xf32>
    %83 = vector.extract_strided_slice %18 {offsets = [0, 6], sizes = [8, 1], strides = [1, 1]} : vector<8x8xf32> to vector<8x1xf32>
    %84 = vector.shape_cast %83 : vector<8x1xf32> to vector<8x1xf32>
    %85 = vector.broadcast %84 : vector<8x1xf32> to vector<8x128xf32>
    %86 = arith.select %82, %85, %76 : vector<8x128xi1>, vector<8x128xf32>
    %87 = vector.extract_strided_slice %18 {offsets = [0, 7], sizes = [8, 1], strides = [1, 1]} : vector<8x8xf32> to vector<8x1xf32>
    %88 = vector.shape_cast %87 : vector<8x1xf32> to vector<8x1xf32>
    %89 = vector.broadcast %88 : vector<8x1xf32> to vector<8x128xf32>
    %90 = arith.select %82, %89, %80 : vector<8x128xi1>, vector<8x128xf32>
    %cst_23 = arith.constant 7.000000e+00 : f32
    %91 = vector.broadcast %cst_23 : f32 to vector<8x128xf32>
    %92 = arith.cmpf oeq, %13, %91 : vector<8x128xf32>
    %93 = vector.extract_strided_slice %18 {offsets = [0, 7], sizes = [8, 1], strides = [1, 1]} : vector<8x8xf32> to vector<8x1xf32>
    %94 = vector.shape_cast %93 : vector<8x1xf32> to vector<8x1xf32>
    %95 = vector.broadcast %94 : vector<8x1xf32> to vector<8x128xf32>
    %96 = arith.select %92, %95, %86 : vector<8x128xi1>, vector<8x128xf32>
    %97 = vector.extract_strided_slice %18 {offsets = [0, 7], sizes = [8, 1], strides = [1, 1]} : vector<8x8xf32> to vector<8x1xf32>
    %98 = vector.shape_cast %97 : vector<8x1xf32> to vector<8x1xf32>
    %99 = vector.broadcast %98 : vector<8x1xf32> to vector<8x128xf32>
    %100 = arith.select %92, %99, %90 : vector<8x128xi1>, vector<8x128xf32>
    %101 = arith.addf %3, %96 : vector<8x128xf32>
    %102 = arith.subf %100, %96 : vector<8x128xf32>
    %103 = arith.mulf %14, %102 : vector<8x128xf32>
    %104 = arith.addf %101, %103 : vector<8x128xf32>
    %c0_24 = arith.constant 0 : index
    %c0_25 = arith.constant 0 : index
    %c0_26 = arith.constant 0 : index
    %105 = vector.load %arg7[%c0_24, %c0_25, %c0_26] : memref<1x8x128xf32, #tpu.memory_space<vmem>>, vector<1x8x128xf32>
    %106 = vector.shape_cast %105 : vector<1x8x128xf32> to vector<8x128xf32>
    %107 = vector.shape_cast %104 : vector<8x128xf32> to vector<1x8x128xf32>
    tpu.vector_store %arg7[%c0_24, %c0_25, %c0_26], %107 {strides = array<i32>} : memref<1x8x128xf32, #tpu.memory_space<vmem>>, vector<1x8x128xf32>,
    return
  }
  func.func @transform_0(%arg0: i32, %arg1: i32) -> (i32, i32, i32) {
    %c0_i32 = arith.constant 0 : i32
    %c0_i32_0 = arith.constant 0 : i32
    return %arg1, %arg0, %c0_i32 : i32, i32, i32
  }
  func.func @transform_1(%arg0: i32, %arg1: i32) -> (i32, i32, i32) {
    %c0_i32 = arith.constant 0 : i32
    %c0_i32_0 = arith.constant 0 : i32
    return %arg1, %arg0, %c0_i32 : i32, i32, i32
  }
  func.func @transform_2(%arg0: i32, %arg1: i32) -> (i32, i32) {
    %c0_i32 = arith.constant 0 : i32
    %c0_i32_0 = arith.constant 0 : i32
    return %arg0, %c0_i32 : i32, i32
  }
  func.func @transform_3(%arg0: i32, %arg1: i32) -> (i32, i32) {
    %c0_i32 = arith.constant 0 : i32
    %c0_i32_0 = arith.constant 0 : i32
    %c0_i32_1 = arith.constant 0 : i32
    return %c0_i32, %c0_i32_0 : i32, i32
  }
  func.func @transform_4(%arg0: i32, %arg1: i32) -> (i32, i32) {
    %c0_i32 = arith.constant 0 : i32
    %c0_i32_0 = arith.constant 0 : i32
    %c0_i32_1 = arith.constant 0 : i32
    return %c0_i32, %c0_i32_0 : i32, i32
  }
  func.func @transform_5(%arg0: i32, %arg1: i32) -> (i32, i32, i32) {
    %c0_i32 = arith.constant 0 : i32
    %c0_i32_0 = arith.constant 0 : i32
    return %arg1, %arg0, %c0_i32 : i32, i32, i32
  }
}

</mosaic_0001>

<bundles_post_ra>
// kernel: tpu_custom_call.1
= control target key start
LH: loop header
LB: loop body
LE: loop exit
PB: predicated region body
PF: predicated region fallthrough
CT: control target
= control target key end

     0   :  { %10 = vsyncpa [#allocation3], 0  ;;  %s1352_s0 = inlined_call_operand.vmem [shape: f32[4,8,32], index: 0, kind: input, shape index: {}]   ;;  %s1353_s1 = inlined_call_operand.hbm [shape: f32[4,8,128], index: 1, kind: input, shape index: {}]   ;;  %s1354_s2 = inlined_call_operand.vmem [shape: f32[8,128], index: 2, kind: input, shape index: {}]   ;;  %s1355_s3 = inlined_call_operand.vmem [shape: f32[32,8], index: 3, kind: input, shape index: {}]   ;;  %s1356_s4 = inlined_call_operand.hbm [shape: f32[128,128], index: 4, kind: input, shape index: {}]   ;;  %s1357_s5 = inlined_call_operand.hbm [shape: f32[4,8,128], index: 5, kind: output, shape index: {}]  }
   0x1   :  { %12 = vsyncpa [#allocation3 + $0x1], 0 }
   0x2   :  { %13 = vsyncpa [#allocation6], 0 }
   0x3   :  { %14 = vsyncpa [#allocation4], 0 }
   0x4   :  { %16 = vsyncpa [#allocation4 + $0x1], 0  ;;  %s1099_s18 = smov 0   ;;  %s1101_s19 = smov 0  }
   0x5   :  { %s1103_s20 = smov 0   ;;  %s1105_s21 = smov 0  }
   0x6   :  { %s1107_s22 = smov 0   ;;  %s1109_s23 = smov 0  }
   0x7 LB: > { %s691_s24 = sadd.s32 4294967295, %s1051_s23   ;;  %s692_s25 = sadd.s32 4294967294, %s1051_s23   ;;  %s1051_s23 = sphi %s1109_s23, %s22_s23   ;;  %s1047_s22 = sphi %s1107_s22, %s1380_s22   ;;  %s1043_s21 = sphi %s1105_s21, %s1379_s21   ;;  %s1039_s20 = sphi %s1103_s20, %s1378_s20   ;;  %s1035_s19 = sphi %s1101_s19, %s1377_s19   ;;  %s1031_s18 = sphi %s1099_s18, %s1376_s18  }
   0x8   : > { %p84_p0 = scmp.ne.s32.totalorder %s1035_s19, %s1031_s18  ;;  %p1133_p1 = scmp.eq.s32.totalorder %s691_s24, 0 }
   0x9   : > { %p1137_p2 = scmp.eq.s32.totalorder %s691_s24, 3  ;;  %p184_p3 = scmp.eq.s32.totalorder %s692_s25, 3 }
   0xa   : > { %s1362_s26 = scalar_select %p1133_p1, 1, 0 }
   0xb   : > { %s1363_s27 = scalar_select %p1137_p2, 1, 0 }
   0xc   : > { %p1143_p4 = por %p1133_p1, %p84_p0  ;;  %p693_p5 = scmp.ge.s32.totalorder %s1051_s23, 1 }
   0xd   : > { %p1148_p6 = por %p184_p3, %p84_p0  ;;  %p191_p7 = scmp.lt.s32.totalorder %s1051_s23, 5 }
   0xe   : > { %s1364_s28 = scalar_select %p1143_p4, 1, 0 }
   0xf   : > { %s1365_s29 = scalar_select %p1148_p6, 1, 0 }
  0x10   : > { %p1153_p8 = pnand %p693_p5, %p191_p7  ;;  %s1053_s6 = smov [#allocation5]  }
  0x11   : > { %s213_s7 = sshll.u32 %s1053_s6, 4  ;;  %s31_s9 = sadd.s32 1, %s1047_s22  ;;  %s214_s7 = int_to_ptr.vmem [resolvable:$true] %s213_s7 }
  0x12   : > { %s1366_s30 = scalar_select %p1153_p8, 1, 0 }
  0x13   : > { %p816_p9 = pneg %p1153_p8  ;;  %s907_s12 = scalar_lea.hbm %s1356_s4, 2048 }
  0x14   : > { %p908_p11 = scmp.ne.s32.totalorder %s1356_s4, %s907_s12  ;;  %p914_p3 = scmp.lt.u32.totalorder %s907_s12, %s1356_s4 }
  0x15   : > { %p1161_p10 = pnand %p816_p9, %p1133_p1 }
  0x17   : > { %p909_p12 = pneg %p1161_p10 }
  0x19   : > { %p910_p13 = pnand %p909_p12, %p908_p11 }
  0x1b   : > { %p911_p0 = pneg %p910_p13 }
  0x1d   : > { %p916_p5 = pnand %p914_p3, %p911_p0 }
  0x1f   : > { %919 = shalt.err (!%p916_p5)
}
  0x20   : > { %s920_s17 = scalar_lea.vmem %s214_s7, 2048  ;;  %p928_p1 = scmp.lt.s32.totalorder %s214_s7, %s214_s7 }
  0x21   : > { %p921_p7 = scmp.ne.s32.totalorder %s214_s7, %s920_s17  ;;  %p929_p4 = scmp.lt.s32.totalorder %s920_s17, %s920_s17 }
  0x23   : > { %p923_p9 = pnand %p921_p7, %p909_p12  ;;  %p930_p8 = por %p929_p4, %p928_p1 }
  0x25   : > { %p924_p6 = pneg %p923_p9 }
  0x27   : > { %p931_p2 = pnand %p930_p8, %p924_p6 }
  0x29   : > { %934 = shalt.err (!%p931_p2)
}
  0x2a   : > { %s1054_s24 = smov 128   ;;  %s1055_s25 = smov 8  }
  0x2b   : > { %819 = dma.hbm_to_vmem [thread:$0]  (!%p1161_p10), %s1356_s4, 2048, %s214_s7, [#allocation6], %s1054_s24, %s1054_s24, %s1055_s25  }
  0x2c   : > { %p32_p1 = scmp.ge.s32.totalorder %s31_s9, 4  ;;  %s71_s11 = sadd.s32 1, %s1039_s20 }
  0x2d   : > { %p78_p2 = scmp.ne.s32.totalorder %s1039_s20, %s1035_s19  ;;  %p79_p4 = scmp.eq.s32.totalorder %s1051_s23, 0 }
  0x2e   : > { %s1382_s9 = smov (%p32_p1, %s31_s9), 0  ;;  %p1369_p8 = scmp.ne.s32.totalorder %s1363_s27, 0 }
  0x2f   : > { %p1188_p6 = por %p79_p4, %p78_p2  ;;  %s66_s8 = ssub.s32 %s1047_s22, %s1382_s9 }
  0x30   : > { %p1194_p11 = por %p1369_p8, %p78_p2  ;;  %p829_p12 = scmp.lt.s32.totalorder %s1051_s23, 4 }
  0x31   : > { %p69_p10 = scmp.eq.s32.totalorder %s66_s8, 0  ;;  %s237_s7 = sand.u32 1, %s1039_s20  }
  0x32   : > { %s697_s14 = sshll.u32 %s237_s7, 3  ;;  %s698_s16 = sshll.u32 %s1047_s22, 7 }
  0x33   : > { %s1203_s15 = scalar_select %p69_p10, %s1039_s20, %s71_s11  }
  0x34   : > { %s1209_s25 = scalar_lea.hbm %s1353_s1, %s698_s16  ;;  %s241_s27 = scalar_lea.vmem [#allocation2], %s697_s14 }
  0x35   : > { %s249_s6 = sshll.u32 %s241_s27, 4  ;;  %p1215_p13 = pnand %p829_p12, %p1188_p6  ;;  %s1211_s6 = int_to_ptr.vmem [resolvable:$true] %s249_s6 }
  0x36   : > { %s238_s11 = scalar_lea.sflag [#allocation3], %s237_s7  ;;  %s935_s8 = scalar_lea.hbm %s1209_s25, 128 }
  0x37   : > { %p936_p0 = scmp.ne.s32.totalorder %s1209_s25, %s935_s8  ;;  %p937_p3 = pneg %p1215_p13 }
  0x38   : > { %s940_s17 = scalar_lea.hbm %s1353_s1, 512  ;;  %p941_p9 = scmp.lt.u32.totalorder %s1209_s25, %s1353_s1 }
  0x39   : > { %p938_p5 = pnand %p937_p3, %p936_p0  ;;  %p942_p1 = scmp.lt.u32.totalorder %s940_s17, %s935_s8 }
  0x3a   : > { %p944_p4 = scmp.lt.u32.totalorder %s935_s8, %s1209_s25 }
  0x3b   : > { %p939_p7 = pneg %p938_p5  ;;  %p943_p2 = por %p942_p1, %p941_p9 }
  0x3d   : > { %p945_p6 = por %p944_p4, %p943_p2 }
  0x3f   : > { %p946_p8 = pnand %p945_p6, %p939_p7 }
  0x41   : > { %949 = shalt.err (!%p946_p8)
}
  0x42   : > { %s950_s7 = scalar_lea.vmem %s1211_s6, 128  ;;  %s1056_s27 = smov [#allocation2]  }
  0x43   : > { %p951_p12 = scmp.ne.s32.totalorder %s1211_s6, %s950_s7  ;;  %s955_s14 = sshll.u32 %s1056_s27, 4  ;;  %s956_s14 = int_to_ptr.vmem [resolvable:$false] %s955_s14 }
  0x44   : > { %s957_s16 = scalar_lea.vmem %s956_s14, 256  ;;  %p958_p5 = scmp.lt.s32.totalorder %s1211_s6, %s956_s14 }
  0x45   : > { %p953_p10 = pnand %p951_p12, %p937_p3  ;;  %p959_p9 = scmp.lt.s32.totalorder %s957_s16, %s950_s7 }
  0x47   : > { %p954_p0 = pneg %p953_p10  ;;  %p960_p1 = por %p959_p9, %p958_p5 }
  0x49   : > { %p961_p2 = pnand %p960_p1, %p954_p0 }
  0x4b   : > { %964 = shalt.err (!%p961_p2)
}
  0x4c   : > { %823 = dma.hbm_to_vmem [thread:$0]  (!%p1215_p13), %s1209_s25, 128, %s1211_s6, %s238_s11  }
  0x4d   : > { %p1372_p7 = scmp.ne.s32.totalorder %s1366_s30, 0 }
  0x4e   : > { %s1247_s8 = sand.u32 (!%p1372_p7), 1, %s1035_s19   ;;  %p1373_p3 = scmp.ne.s32.totalorder (!%p1372_p7), %s1364_s28, 0 }
  0x4f   : > { %258 = sbr.rel (%p1372_p7) target bundleno = 483 (0x1e3), region = 40  ;;  %s700_s17 = sshll.u32 (!%p1372_p7), %s1247_s8, 3 }
  0x50   : > { %s261_s12 = scalar_lea.sflag (!%p1372_p7), [#allocation3], %s1247_s8  ;;  %s1253_s24 = scalar_lea.vmem (!%p1372_p7), [#allocation2], %s700_s17 }
  0x56   : > { %1018 = dma.done.wait (%p1373_p3), %s261_s12, 128  }
  0x57   : > { %1020 = vsyncadd (%p1373_p3), %s261_s12, 4294967168  ;;  %p1374_p13 = scmp.ne.s32.totalorder %s1362_s26, 0 }
  0x59   : > { %1022 = dma.done.wait (%p1374_p13), [#allocation6], 2048  }
  0x5a   : > { %1024 = vsyncadd (%p1374_p13), [#allocation6], 4294965248  ;;  %p306_p4 = scmp.lt.s32.totalorder %s1043_s21, 3  ;;  %v1057_v0 = vmov 0.0|0.0   ;;  %vm1058_vm0 = vmmov 0   ;;  %v1059_v1 = vmov 0.0  }
  0x5b   : > { %802 = vmatprep.subr.bf16.mxu1 %v1057_v0  ;;  %775 = vmatprep.mubr.msk.f32.mxu1 %vm1058_vm0, %v1059_v1  ;;  %v1060_v2 = vmov 2   ;;  %v1061_v3 = vmov 0   ;;  %v416_v4 = vld [vmem:[%s1355_s3] sm:$0xff]  ;;  %v417_v5 = vld [vmem:[%s1355_s3 + $0x8] sm:$0xff]  ;;  %v418_v6 = vld [vmem:[%s1355_s3 + $0x10] sm:$0xff]  ;;  %vm420_vm1 = vcmask 261120  }
  0x5c   : > { %778 = vmatprep.subr.bf16.mxu0 %v1057_v0  ;;  %764 = vmatprep.mubr.msk.f32.mxu0 %vm1058_vm0, %v1059_v1  ;;  %s307_s28 = scalar_select %p306_p4, %s1043_s21, 3  ;;  %v803_v7 = vpack.c.bf16 %v417_v5, %v416_v4  ;;  %v419_v8 = vld [vmem:[%s1355_s3 + $0x18] sm:$0xff]  ;;  %v326_v9 = vld [vmem:[#allocation5] sm:$0xff]  ;;  %v328_v11 = vld [vmem:[#allocation5 + $0x10] sm:$0xff]  ;;  %v1062_v44 = vmov 3   ;;  %v1063_v45 = vmov 1  }
  0x5d   : > { %896 = vset.pattern.permute.xlu1 %v1060_v2  ;;  %894 = vset.pattern.permute.xlu0 %v1061_v3  ;;  %v327_v10 = vld [vmem:[#allocation5 + $0x8] sm:$0xff]  ;;  %v329_v12 = vld [vmem:[#allocation5 + $0x18] sm:$0xff]  ;;  %v806_v13 = vpack.c.bf16 %v419_v8, %v418_v6  ;;  %v330_v16 = vld [vmem:[#allocation5 + $0x20] sm:$0xff]  ;;  %v1064_v46 = vmov 4   ;;  %v1065_v47 = vmov 5   ;;  %v1066_v48 = vmov 6  }
  0x5e   : > { %s703_s14 = sshll.u32 %s307_s28, 3  ;;  %804 = vmatpush3.bf16.msra.mxu1 %v803_v7  ;;  %v779_v14 = vpack.c.bf16 %v327_v10, %v326_v9  ;;  %v782_v15 = vpack.c.bf16 %v329_v12, %v328_v11  ;;  %v331_v17 = vld [vmem:[#allocation5 + $0x28] sm:$0xff]  ;;  %v317_v19 = vld [vmem:[%s1253_s24] sm:$0xff]  ;;  %v334_v27 = vld [vmem:[#allocation5 + $0x40] sm:$0xff]  ;;  %v1067_v49 = vmov 7   ;;  %s707_s24 = sshll.u32 %s1043_s21, 7 }
  0x5f   : > { %805 = vmatprep.subr.bf16.mxu1 %v1057_v0  ;;  %s312_s30 = scalar_lea.vmem %s1352_s0, %s703_s14  ;;  %v318_v20 = vld [vmem:[%s1354_s2] sm:$0xff]  ;;  %v785_v22 = vpack.c.bf16 %v331_v17, %v330_v16  ;;  %v333_v24 = vld [vmem:[#allocation5 + $0x38] sm:$0xff]  ;;  %v335_v28 = vld [vmem:[#allocation5 + $0x48] sm:$0xff]  ;;  %s305_s25 = scalar_lea.vmem [#allocation7], %s700_s17 }
  0x60   : > { %780 = vmatpush3.bf16.msra.mxu0 %v779_v14  ;;  %v415_v18 = vld [vmem:[%s312_s30] sm:$0xff]  ;;  %v1288_v21 = vadd.f32 %v318_v20, %v317_v19  ;;  %v791_v29 = vpack.c.bf16 %v335_v28, %v334_v27  ;;  %v337_v31 = vld [vmem:[#allocation5 + $0x58] sm:$0xff]  ;;  %v338_v34 = vld [vmem:[#allocation5 + $0x60] sm:$0xff]  ;;  %s571_s6 = sshll.u32 %s305_s25, 4  ;;  %s1304_s7 = scalar_lea.hbm %s1357_s5, %s707_s24  ;;  %s1306_s6 = int_to_ptr.vmem [resolvable:$true] %s571_s6 }
  0x61   : > { %781 = vmatprep.subr.bf16.mxu0 %v1057_v0  ;;  %v332_v23 = vld [vmem:[#allocation5 + $0x30] sm:$0xff]  ;;  %v339_v35 = vld [vmem:[#allocation5 + $0x68] sm:$0xff]  ;;  %v341_v39 = vld [vmem:[#allocation5 + $0x78] sm:$0xff]  ;;  %s557_s27 = scalar_lea.sflag [#allocation4], %s1247_s8  ;;  %s965_s21 = scalar_lea.vmem %s1306_s6, 128 }
  0x62   : > { %807 = vmatpush3.bf16.msra.mxu1 %v806_v13  ;;  %v704_v25 = vmul.f32 -1.442695, %v1288_v21  ;;  %v788_v26 = vpack.c.bf16 %v333_v24, %v332_v23  ;;  %v336_v30 = vld [vmem:[#allocation5 + $0x50] sm:$0xff]  ;;  %v797_v37 = vpack.c.bf16 %v339_v35, %v338_v34  ;;  %p966_p6 = scmp.ne.s32.totalorder %s1306_s6, %s965_s21  ;;  %s1068_s17 = smov [#allocation7]  }
  0x63   : > { %v794_v32 = vpack.c.bf16 %v337_v31, %v336_v30  ;;  %v340_v38 = vld [vmem:[#allocation5 + $0x70] sm:$0xff]  ;;  %s969_s14 = sshll.u32 %s1068_s17, 4  ;;  %s970_s14 = int_to_ptr.vmem [resolvable:$false] %s969_s14 }
  0x64   : > { %783 = vmatpush3.bf16.msra.mxu0 %v782_v15  ;;  %903 = vpow2.f32 %v704_v25  ;;  %v800_v40 = vpack.c.bf16 %v341_v39, %v340_v38  ;;  %p967_p8 = pnand %p966_p6, %p1194_p11  ;;  %s971_s16 = scalar_lea.vmem %s970_s14, 256 }
  0x65   : > { %776 = vmatmul.mubr.msk.f32.vlgmr.msra.gmra.mrb[0].mxu1 %vm420_vm1, %v415_v18  ;;  %784 = vmatprep.subr.bf16.mxu0 %v1057_v0  ;;  %p972_p10 = scmp.lt.s32.totalorder %s1306_s6, %s970_s14  ;;  %p973_p0 = scmp.lt.s32.totalorder %s971_s16, %s965_s21 }
  0x66   : > { %p968_p12 = pneg %p967_p8 }
  0x67   : > { %p974_p5 = por %p973_p0, %p972_p10 }
  0x68   : > { %786 = vmatpush3.bf16.msra.mxu0 %v785_v22 }
  0x69   : > { %787 = vmatprep.subr.bf16.mxu0 %v1057_v0  ;;  %p975_p9 = pnand %p974_p5, %p968_p12 }
  0x6c   : > { %789 = vmatpush3.bf16.msra.mxu0 %v788_v26 }
  0x6d   : > { %790 = vmatprep.subr.bf16.mxu0 %v1057_v0 }
  0x6e   : > { %v904_v33 = vpop.eup %903 }
  0x6f   : > { %v323_v36 = vadd.f32 1.0, %v904_v33 }
  0x70   : > { %792 = vmatpush3.bf16.msra.mxu0 %v791_v29 }
  0x71   : > { %793 = vmatprep.subr.bf16.mxu0 %v1057_v0  ;;  %905 = vrcp.f32 %v323_v36 }
  0x74   : > { %795 = vmatpush3.bf16.msra.mxu0 %v794_v32 }
  0x75   : > { %796 = vmatprep.subr.bf16.mxu0 %v1057_v0 }
  0x78   : > { %798 = vmatpush3.bf16.msra.mxu0 %v797_v37 }
  0x79   : > { %799 = vmatprep.subr.bf16.mxu0 %v1057_v0 }
  0x7b   : > { %v906_v41 = vpop.eup %905 }
  0x7c   : > { %801 = vmatpush3.bf16.msra.mxu0 %v800_v40 }
  0x7f   : > { %765 = vmatmul.mubr.f32.vlgmr.msra.gmra.mrb[0].mxu0 %v906_v41 }
 0x138   : > { %v490_v42 = vpop.f32.mrb[0].mxu1 }
 0x139   : > { %509 = vperm.xlu1 %896, %v490_v42   ;;  %497 = vperm.xlu0 %894, %v490_v42   ;;  %v777_v43 = vpop.f32.mrb[1].mxu1 }
 0x13d   : > { %897 = vset.pattern.permute.xlu1 %v1062_v44  ;;  %895 = vset.pattern.permute.xlu0 %v1063_v45 }
 0x13e   : > { %516 = vperm.xlu1 %897, %v490_v42   ;;  %502 = vperm.xlu0 %895, %v490_v42  }
 0x142   : > { %898 = vset.pattern.permute.xlu1 %v1064_v46  ;;  %899 = vset.pattern.permute.xlu0 %v1065_v47 }
 0x143   : > { %523 = vperm.xlu1 %898, %v490_v42   ;;  %530 = vperm.xlu0 %899, %v490_v42  }
 0x147   : > { %900 = vset.pattern.permute.xlu1 %v1066_v48  ;;  %902 = vset.pattern.permute.xlu0 %v1067_v49 }
 0x148   : > { %537 = vperm.xlu1 %900, %v490_v42  }
 0x14c   : > { %901 = vset.pattern.permute.xlu1 %v1067_v49 }
 0x14d   : > { %544 = vperm.xlu1 %901, %v490_v42  }
 0x152   : > { %v408_v50 = vpop.f32.mrb[0].mxu0 }
 0x153   : > { %v766_v51 = vpop.f32.mrb[1].mxu0  ;;  %v412_v52 = vmin.f32 %v408_v50, 7.0 }
 0x155   : > { %v413_v55 = vfloor.f32 %v412_v52 }
 0x157   : > { %vm494_vm2 = vcmp.eq.f32.partialorder %v413_v55, 0.0  ;;  %vm506_vm3 = vcmp.eq.f32.partialorder %v413_v55, 1.0  ;;  %vm513_vm4 = vcmp.eq.f32.partialorder %v413_v55, 2.0  ;;  %vm520_vm5 = vcmp.eq.f32.partialorder %v413_v55, 3.0 }
 0x158   : > { %vm527_vm6 = vcmp.eq.f32.partialorder %v413_v55, 4.0  ;;  %vm534_vm7 = vcmp.eq.f32.partialorder %v413_v55, 5.0  ;;  %vm541_vm8 = vcmp.eq.f32.partialorder %v413_v55, 6.0  ;;  %vm548_vm9 = vcmp.eq.f32.partialorder %v413_v55, 7.0 }
 0x159   : > { %v414_v14 = vsub.f32 %v412_v52, %v413_v55 }
 0x1b8   : > { %v510_v53 = vpop.permute.xlu1 %509  ;;  %v498_v54 = vpop.permute.xlu0 %497 }
 0x1b9   : > { %v500_v58 = vsel %vm494_vm2, %v498_v54, 0.0 }
 0x1bd   : > { %v517_v56 = vpop.permute.xlu1 %516  ;;  %v503_v57 = vpop.permute.xlu0 %502 }
 0x1be   : > { %v505_v59 = vsel %vm494_vm2, %v503_v57, 0.0  ;;  %v507_v60 = vsel %vm506_vm3, %v503_v57, %v500_v58 }
 0x1bf   : > { %v512_v62 = vsel %vm506_vm3, %v510_v53, %v505_v59  ;;  %v514_v63 = vsel %vm513_vm4, %v510_v53, %v507_v60 }
 0x1c0   : > { %v519_v0 = vsel %vm513_vm4, %v517_v56, %v512_v62  ;;  %v521_v1 = vsel %vm520_vm5, %v517_v56, %v514_v63 }
 0x1c2   : > { %v524_v61 = vpop.permute.xlu1 %523  ;;  %v531_v5 = vpop.permute.xlu0 %530 }
 0x1c3   : > { %v526_v3 = vsel %vm520_vm5, %v524_v61, %v519_v0  ;;  %v528_v4 = vsel %vm527_vm6, %v524_v61, %v521_v1 }
 0x1c4   : > { %v533_v6 = vsel %vm527_vm6, %v531_v5, %v526_v3  ;;  %v535_v7 = vsel %vm534_vm7, %v531_v5, %v528_v4 }
 0x1c7   : > { %v538_v2 = vpop.permute.xlu1 %537 }
 0x1c8   : > { %v540_v8 = vsel %vm534_vm7, %v538_v2, %v533_v6  ;;  %v542_v9 = vsel %vm541_vm8, %v538_v2, %v535_v7 }
 0x1cc   : > { %v545_v10 = vpop.permute.xlu1 %544 }
 0x1cd   : > { %v547_v11 = vsel %vm541_vm8, %v545_v10, %v540_v8  ;;  %v549_v12 = vsel %vm548_vm9, %v545_v10, %v542_v9 }
 0x1ce   : > { %v550_v13 = vsel %vm548_vm9, %v545_v10, %v547_v11  ;;  %v551_v16 = vadd.f32 %v549_v12, %v1288_v21 }
 0x1cf   : > { %v552_v15 = vsub.f32 %v550_v13, %v549_v12 }
 0x1d1   : > { %v553_v17 = vmul.f32 %v552_v15, %v414_v14 }
 0x1d3   : > { %v554_v18 = vadd.f32 %v553_v17, %v551_v16 }
 0x1d5   : > { %555 = vst [vmem:[%s305_s25] sm:$0xff] %v554_v18 }
 0x1d6   : > { %978 = shalt.err (!%p975_p9)
}
 0x1d7   : > { %s979_s8 = scalar_lea.hbm %s1304_s7, 128  ;;  %s983_s28 = scalar_lea.hbm %s1357_s5, 512 }
 0x1d8   : > { %p980_p1 = scmp.ne.s32.totalorder %s1304_s7, %s979_s8  ;;  %p984_p3 = scmp.lt.u32.totalorder %s1304_s7, %s1357_s5 }
 0x1d9   : > { %p985_p13 = scmp.lt.u32.totalorder %s983_s28, %s979_s8  ;;  %p987_p6 = scmp.lt.u32.totalorder %s979_s8, %s1304_s7 }
 0x1da   : > { %p981_p2 = pnand %p980_p1, %p1194_p11 }
 0x1db   : > { %p986_p4 = por %p985_p13, %p984_p3 }
 0x1dc   : > { %p982_p7 = pneg %p981_p2 }
 0x1dd   : > { %p988_p8 = por %p987_p6, %p986_p4 }
 0x1df   : > { %p989_p12 = pnand %p988_p8, %p982_p7 }
 0x1e1   : > { %992 = shalt.err (!%p989_p12)
}
 0x1e2   : > { %814 = dma.vmem_to_hbm [thread:$0]  (%p1194_p11), %s1306_s6, 128, %s1304_s7, %s557_s27  }
 0x1e3 PF: > { %p831_p10 = scmp.ge.s32.totalorder %s1051_s23, 2  ;;  %s583_s25 = sand.u32 1, %s1031_s18  }
 0x1e4   : > { %p1375_p0 = scmp.ne.s32.totalorder %s1365_s29, 0  ;;  %s584_s10 = scalar_lea.sflag [#allocation4], %s583_s25 }
 0x1e6   : > { %p825_p5 = pnand %p831_p10, %p1375_p0 }
 0x1e8   : > { %1026 = dma.done.wait (!%p825_p5), %s584_s10, 128  }
 0x1e9   : > { %1028 = vsyncadd (!%p825_p5), %s584_s10, 4294967168  ;;  %s22_s23 = sadd.s32 1, %s1051_s23   ;;  %s1376_s18 = smov %s1035_s19 }
 0x1ea   : > { %p19_p9 = scmp.ge.s32.totalorder %s22_s23, 6   ;;  %s1377_s19 = smov %s1039_s20 }
 0x1eb   : > { %s1378_s20 = smov %s1203_s15  ;;  %s1379_s21 = smov %s1047_s22 }
 0x1ec   : > { %s1380_s22 = smov %s1382_s9  ;;  %21 = sbr.rel (!%p19_p9) target bundleno = 7 (0x7), region = 95 }
 0x1f3   :  { %589 = vsyncpa [#allocation3], 1 }
 0x1f4   :  { %591 = vsyncpa [#allocation3 + $0x1], 1 }
 0x1f5   :  { %592 = vsyncpa [#allocation6], 1 }
 0x1f6   :  { %593 = vsyncpa [#allocation4], 1 }
 0x1f7   :  { %595 = vsyncpa [#allocation4 + $0x1], 1 }

</bundles_post_ra>
